<compile_context>
chip_gen: v5e
topology: v5e:2x2
jax: 0.10.0
libtpu: 0.0.40
codegen_flags: <defaults>
</compile_context>

<pallas_src>
import jax
import jax.numpy as jnp
from jax.experimental import pallas as pl
from jax.experimental.pallas import tpu as pltpu

EPS = 1e-10

_LANE = 128
_MAX_T_HW = 32768            # lane-tile cap (review: 16K-32K when rows are few)
_MAX_PACKED_ROWS = 128       # sublane-row block cap (packed small-C path)


def _round_up(x: int, m: int) -> int:
    return ((x + m - 1) // m) * m


def _vmem_capacity_bytes() -> int:
    try:
        return int(pltpu.get_tpu_info().vmem_capacity_bytes)
    except Exception:
        return 64 * 1024 * 1024        # conservative fallback (v7x per-TC VMEM)


_VMEM_CAP = _vmem_capacity_bytes()
# Scoped-VMEM limit: ~64 MiB on 128 MiB parts (v5e/v6e), 48 MiB on 64 MiB v7x.
_VMEM_LIMIT = min((3 * _VMEM_CAP) // 4, 64 * 1024 * 1024)
# Per x/out block budget: ~6x block bytes live at once
# (in + out double-buffered plus the f32 astype / product temporaries).
_BLOCK_BYTE_BUDGET = _VMEM_LIMIT // 6


def _pick_t_hw(rows_per_block: int, hw: int, itemsize: int) -> int:
    """Largest lane tile (multiple of 128, never exceeding hw) within budget."""
    if hw <= _LANE:
        return hw                                   # block == full lane extent
    t = _BLOCK_BYTE_BUDGET // max(1, rows_per_block * itemsize)
    t = max(_LANE, (t // _LANE) * _LANE)
    t = min(t, _MAX_T_HW, (hw // _LANE) * _LANE)
    return t


def _split_for_two_cores(n_row_tiles: int, hw: int, t_hw: int) -> int:
    """v7x has 2 TCs: make sure the 'parallel' grid has >=2 tiles if possible."""
    while t_hw > _LANE and n_row_tiles * pl.cdiv(hw, t_hw) < 2:
        t_hw = max(_LANE, ((t_hw // 2) // _LANE) * _LANE)
    return t_hw


def _cost(n: int, c: int, hw: int, itemsize: int) -> pl.CostEstimate:
    return pl.CostEstimate(
        flops=5 * n * c * hw,
        transcendentals=2 * n * hw,                 # sqrt + reciprocal / position
        bytes_accessed=2 * n * c * hw * itemsize,
    )


# --------------------------------------------------------------------------
# Kernels
# --------------------------------------------------------------------------
def _make_packed_kernel(rows: int, r_tile: int, mask_rows: bool):
    """Small-C path. x/o: (R, T); a: (R, R) block-diag group-sum; w: (R, 1)."""

    def kernel(x_ref, a_ref, w_ref, o_ref):
        x = x_ref[...].astype(jnp.float32)
        if mask_rows:
            # Zero garbage tail rows so stale inf/NaN cannot leak through the
            # 0-coefficients of the group-sum matmul below.
            rid = pl.program_id(0) * r_tile + jax.lax.broadcasted_iota(
                jnp.int32, (r_tile, 1), 0)
            x = jnp.where(rid < rows, x, 0.0)
        # Per-(group, lane) sum of squares broadcast back to every row of the
        # group via a tiny MXU matmul (no in-kernel reshapes/relayouts).
        ss = jnp.dot(a_ref[...], x * x, preferred_element_type=jnp.float32)
        inv = pl.reciprocal(jnp.sqrt(ss) + EPS, approx=True)   # EUP, ~free
        o_ref[...] = (x * (w_ref[...] * inv)).astype(o_ref.dtype)

    return kernel


def _l2norm_kernel(x_ref, w_ref, o_ref):
    """General path. x/o: (1, C, T); w: (C, 1)."""
    x = x_ref[...].astype(jnp.float32)
    ss = jnp.sum(x * x, axis=1, keepdims=True)               # (1, 1, T)
    inv = pl.reciprocal(jnp.sqrt(ss) + EPS, approx=True)     # EUP, ~free
    o_ref[...] = (x * (w_ref[...][None, :, :] * inv)).astype(o_ref.dtype)


# --------------------------------------------------------------------------
# Wrappers
# --------------------------------------------------------------------------
def _l2norm_small_c(x_nchw: jax.Array, weight: jax.Array) -> jax.Array:
    """C in {1, 2, 4}: fold batch+channel onto sublanes for full vregs."""
    N, C, H, W = x_nchw.shape
    HW = H * W
    rows = N * C
    itemsize = jnp.dtype(x_nchw.dtype).itemsize

    # Sublane granularity: 8 rows for 32-bit, 16 for bf16, 32 for int8/fp8.
    sub = 8 * max(1, 4 // itemsize)
    if rows <= sub:
        R = rows                             # block equals full row extent
    else:
        R = min((rows // sub) * sub, _MAX_PACKED_ROWS)
    # R is a multiple of C (C divides 8 | sub, or R == rows == N*C), so channel
    # groups never straddle row blocks and tail garbage rows form whole,
    # discarded groups.
    mask_rows = (rows % R) != 0

    T_HW = _pick_t_hw(R, HW, itemsize)
    T_HW = _split_for_two_cores(pl.cdiv(rows, R), HW, T_HW)

    x2 = x_nchw.reshape(rows, HW)

    # Block-diagonal "sum over my group" matrix and per-row weights (constant
    # across the grid -> constant index_maps, loaded once).
    row_group = jnp.arange(R, dtype=jnp.int32) // C
    a = (row_group[:, None] == row_group[None, :]).astype(jnp.float32)
    w_rows = jnp.tile(weight.astype(jnp.float32), R // C).reshape(R, 1)

    out = pl.pallas_call(
        _make_packed_kernel(rows, R, mask_rows),
        out_shape=jax.ShapeDtypeStruct((rows, HW), x_nchw.dtype),
        grid_spec=pltpu.PrefetchScalarGridSpec(
            num_scalar_prefetch=0,
            grid=(pl.cdiv(rows, R), pl.cdiv(HW, T_HW)),
            in_specs=[
                pl.BlockSpec((R, T_HW), lambda r, t: (r, t)),
                pl.BlockSpec((R, R), lambda r, t: (0, 0)),
                pl.BlockSpec((R, 1), lambda r, t: (0, 0)),
            ],
            out_specs=pl.BlockSpec((R, T_HW), lambda r, t: (r, t)),
        ),
        compiler_params=pltpu.CompilerParams(
            dimension_semantics=("parallel", "parallel"),
            vmem_limit_bytes=_VMEM_LIMIT,
        ),
        cost_estimate=_cost(N, C, HW, itemsize),
    )(x2, a, w_rows)

    return out.reshape(N, C, H, W)


def _l2norm_general(x_nchw: jax.Array, weight: jax.Array) -> jax.Array:
    """C >= 8 (or C not dividing 8): (1, C, T_HW) blocks, axis-1 reduction."""
    N, C, H, W = x_nchw.shape
    HW = H * W
    itemsize = jnp.dtype(x_nchw.dtype).itemsize

    T_HW = _pick_t_hw(C, HW, itemsize)
    T_HW = _split_for_two_cores(N, HW, T_HW)

    x3 = x_nchw.reshape(N, C, HW)
    w2 = weight.astype(jnp.float32).reshape(C, 1)

    out = pl.pallas_call(
        _l2norm_kernel,
        out_shape=jax.ShapeDtypeStruct((N, C, HW), x_nchw.dtype),
        grid_spec=pltpu.PrefetchScalarGridSpec(
            num_scalar_prefetch=0,
            grid=(N, pl.cdiv(HW, T_HW)),
            in_specs=[
                pl.BlockSpec((1, C, T_HW), lambda n, t: (n, 0, t)),
                pl.BlockSpec((C, 1), lambda n, t: (0, 0)),
            ],
            out_specs=pl.BlockSpec((1, C, T_HW), lambda n, t: (n, 0, t)),
        ),
        compiler_params=pltpu.CompilerParams(
            dimension_semantics=("parallel", "parallel"),
            vmem_limit_bytes=_VMEM_LIMIT,
        ),
        cost_estimate=_cost(N, C, HW, itemsize),
    )(x3, w2)

    return out.reshape(N, C, H, W)


def l2norm(x_nchw: jax.Array, weight: jax.Array) -> jax.Array:
    """SSD L2Norm. x: (N, C, H, W); weight: (C,). Returns (N, C, H, W)."""
    C = x_nchw.shape[1]
    if C < 8 and 8 % C == 0:
        return _l2norm_small_c(x_nchw, weight)
    return _l2norm_general(x_nchw, weight)


def l2norm_reference(x_nchw: jax.Array, weight: jax.Array) -> jax.Array:
    norm = jnp.sqrt(jnp.sum(x_nchw.astype(jnp.float32) ** 2,
                            axis=1, keepdims=True)) + EPS
    return (weight[None, :, None, None] * (x_nchw / norm)).astype(x_nchw.dtype)


if __name__ == "__main__":
    # Module params: n_channels=4, scale=20.0 -> weight initialized to 20.0.
    n_channels = 4
    scale = 20.0
    weight = jnp.full((n_channels,), scale, dtype=jnp.float32)

    key = jax.random.PRNGKey(0)
    x = jax.random.normal(key, (2, n_channels, 16, 16), dtype=jnp.float32)

    out = jax.block_until_ready(l2norm(x, weight))
    ref = l2norm_reference(x, weight)
    assert out.shape == (2, n_channels, 16, 16)
    # Loose tolerance: kernel uses the EUP approximate reciprocal.
    assert jnp.allclose(out, ref, atol=1e-2, rtol=1e-2), "mismatch (packed path)"

    # Exercise the C >= 8 (un-packed, sublane-dense) path.
    c2 = 16
    w_big = jnp.full((c2,), 10.0, dtype=jnp.float32)
    x_big = jax.random.normal(jax.random.PRNGKey(1), (2, c2, 8, 8),
                              dtype=jnp.float32)
    out2 = jax.block_until_ready(l2norm(x_big, w_big))
    ref2 = l2norm_reference(x_big, w_big)
    assert jnp.allclose(out2, ref2, atol=1e-2, rtol=1e-2), "mismatch (general path)"

    # Exercise masked row + lane tails in the packed path (no padding copies).
    x_odd = jax.random.normal(jax.random.PRNGKey(2), (3, n_channels, 17, 17),
                              dtype=jnp.float32)
    out3 = jax.block_until_ready(l2norm(x_odd, weight))
    ref3 = l2norm_reference(x_odd, weight)
    assert jnp.allclose(out3, ref3, atol=1e-2, rtol=1e-2), "mismatch (tail masking)"

    print("KERNEL_OK")
</pallas_src>

<mosaic_0001>
module attributes {stable_mosaic.version = 11 : i64} {
  func.func @kernel(%arg0: i32, %arg1: i32, %arg2: memref<8x128xf32, #tpu.memory_space<vmem>>, %arg3: memref<8x8xf32, #tpu.memory_space<vmem>>, %arg4: memref<8x1xf32, #tpu.memory_space<vmem>>, %arg5: memref<8x128xf32, #tpu.memory_space<vmem>>) attributes {dimension_semantics = [#tpu.dimension_semantics<parallel>, #tpu.dimension_semantics<parallel>], iteration_bounds = array<i64: 1, 2>, scalar_prefetch = 0 : i64, scratch_operands = 0 : i64, tpu.core_type = #tpu.core_type<tc>, window_params = [{transform_indices = @transform_0, window_bounds = array<i64: 8, 128>}, {pipeline_mode = #tpu.pipeline_mode<synchronous>, transform_indices = @transform_1, window_bounds = array<i64: 8, 8>}, {pipeline_mode = #tpu.pipeline_mode<synchronous>, transform_indices = @transform_2, window_bounds = array<i64: 8, 1>}, {transform_indices = @transform_3, window_bounds = array<i64: 8, 128>}]} {
    %c0 = arith.constant 0 : index
    %c0_0 = arith.constant 0 : index
    %0 = vector.load %arg2[%c0, %c0_0] : memref<8x128xf32, #tpu.memory_space<vmem>>, vector<8x128xf32>
    %c0_1 = arith.constant 0 : index
    %c0_2 = arith.constant 0 : index
    %1 = vector.load %arg3[%c0_1, %c0_2] : memref<8x8xf32, #tpu.memory_space<vmem>>, vector<8x8xf32>
    %2 = arith.mulf %0, %0 : vector<8x128xf32>
    %cst = arith.constant dense<0.000000e+00> : vector<8x128xf32>
    %3 = tpu.matmul %1, %2, %cst {dimension_numbers = #tpu.dot_dimension_numbers<[1], [0], [0], [1], [0, 0, 1, 1], [], []>} : vector<8x8xf32>, vector<8x128xf32>, vector<8x128xf32> -> vector<8x128xf32>
    %4 = math.sqrt %3 : vector<8x128xf32>
    %cst_3 = arith.constant 1.000000e-10 : f32
    %5 = vector.broadcast %cst_3 : f32 to vector<8x128xf32>
    %6 = arith.addf %4, %5 : vector<8x128xf32>
    %7 = tpu.reciprocal %6 {approx = true} : vector<8x128xf32> -> vector<8x128xf32>
    %c0_4 = arith.constant 0 : index
    %c0_5 = arith.constant 0 : index
    %8 = vector.load %arg4[%c0_4, %c0_5] : memref<8x1xf32, #tpu.memory_space<vmem>>, vector<8x1xf32>
    %9 = vector.broadcast %8 : vector<8x1xf32> to vector<8x128xf32>
    %10 = arith.mulf %9, %7 : vector<8x128xf32>
    %11 = arith.mulf %0, %10 : vector<8x128xf32>
    %c0_6 = arith.constant 0 : index
    %c0_7 = arith.constant 0 : index
    %12 = vector.load %arg5[%c0_6, %c0_7] : memref<8x128xf32, #tpu.memory_space<vmem>>, vector<8x128xf32>
    tpu.vector_store %arg5[%c0_6, %c0_7], %11 {strides = array<i32>} : memref<8x128xf32, #tpu.memory_space<vmem>>, vector<8x128xf32>,
    return
  }
  func.func @transform_0(%arg0: i32, %arg1: i32) -> (i32, i32) {
    %c0_i32 = arith.constant 0 : i32
    return %arg0, %arg1 : i32, i32
  }
  func.func @transform_1(%arg0: i32, %arg1: i32) -> (i32, i32) {
    %c0_i32 = arith.constant 0 : i32
    %c0_i32_0 = arith.constant 0 : i32
    %c0_i32_1 = arith.constant 0 : i32
    return %c0_i32, %c0_i32_0 : i32, i32
  }
  func.func @transform_2(%arg0: i32, %arg1: i32) -> (i32, i32) {
    %c0_i32 = arith.constant 0 : i32
    %c0_i32_0 = arith.constant 0 : i32
    %c0_i32_1 = arith.constant 0 : i32
    return %c0_i32, %c0_i32_0 : i32, i32
  }
  func.func @transform_3(%arg0: i32, %arg1: i32) -> (i32, i32) {
    %c0_i32 = arith.constant 0 : i32
    return %arg0, %arg1 : i32, i32
  }
}

</mosaic_0001>

<bundles_post_ra>
// kernel: tpu_custom_call.1
= control target key start
LH: loop header
LB: loop body
LE: loop exit
PB: predicated region body
PF: predicated region fallthrough
CT: control target
= control target key end

     0   :  { %8 = vsyncpa [#allocation3], 0  ;;  %s703_s0 = inlined_call_operand.hbm [shape: f32[8,256], index: 0, kind: input, shape index: {}]   ;;  %s704_s1 = inlined_call_operand.vmem [shape: f32[8,8], index: 1, kind: input, shape index: {}]   ;;  %s705_s2 = inlined_call_operand.vmem [shape: f32[8,1], index: 2, kind: input, shape index: {}]   ;;  %s706_s3 = inlined_call_operand.hbm [shape: f32[8,256], index: 3, kind: output, shape index: {}]  }
   0x1   :  { %10 = vsyncpa [#allocation3 + $0x1], 0 }
   0x2   :  { %11 = vsyncpa [#allocation4], 0 }
   0x3   :  { %13 = vsyncpa [#allocation4 + $0x1], 0  ;;  %s573_s12 = smov 0   ;;  %s575_s13 = smov 0  }
   0x4   :  { %s577_s14 = smov 0   ;;  %s579_s15 = smov 0  }
   0x5   :  { %s581_s16 = smov 0   ;;  %s583_s17 = smov 0  }
   0x6 LB: > { %s356_s18 = sadd.s32 4294967295, %s550_s17   ;;  %s357_s19 = sadd.s32 4294967294, %s550_s17   ;;  %s550_s17 = sphi %s583_s17, %s19_s17   ;;  %s546_s16 = sphi %s581_s16, %s715_s16   ;;  %s542_s15 = sphi %s579_s15, %s714_s15   ;;  %s538_s14 = sphi %s577_s14, %s713_s14   ;;  %s534_s13 = sphi %s575_s13, %s712_s13   ;;  %s530_s12 = sphi %s573_s12, %s711_s12  }
   0x7   : > { %s28_s20 = sadd.s32 1, %s546_s16  ;;  %s40_s21 = sadd.s32 1, %s538_s14 }
   0x8   : > { %p29_p0 = scmp.ge.s32.totalorder %s28_s20, 2  ;;  %p47_p1 = scmp.ne.s32.totalorder %s538_s14, %s534_s13 }
   0x9   : > { %p48_p2 = scmp.eq.s32.totalorder %s550_s17, 0  ;;  %p53_p3 = scmp.ne.s32.totalorder %s534_s13, %s530_s12 }
   0xa   : > { %s717_s20 = smov (%p29_p0, %s28_s20), 0  ;;  %p54_p5 = scmp.eq.s32.totalorder %s356_s18, 0 }
   0xb   : > { %p614_p4 = por %p48_p2, %p47_p1  ;;  %s36_s23 = ssub.s32 %s546_s16, %s717_s20 }
   0xc   : > { %p121_p6 = scmp.eq.s32.totalorder %s356_s18, 1  ;;  %p38_p7 = scmp.eq.s32.totalorder %s36_s23, 0 }
   0xd   : > { %p620_p8 = por %p54_p5, %p53_p3  ;;  %p127_p10 = scmp.eq.s32.totalorder %s357_s19, 1 }
   0xe   : > { %p624_p9 = por %p121_p6, %p47_p1  ;;  %p359_p12 = scmp.ge.s32.totalorder %s550_s17, 2 }
   0xf   : > { %s629_s26 = scalar_select %p38_p7, %s538_s14, %s40_s21  }
  0x10   : > { %p631_p11 = por %p127_p10, %p53_p3  ;;  %p382_p13 = scmp.lt.s32.totalorder %s550_s17, 2 }
  0x11   : > { %s153_s28 = sand.u32 1, %s538_s14   ;;  %s361_s30 = sshll.u32 %s546_s16, 3 }
  0x12   : > { %s360_s29 = sshll.u32 %s153_s28, 3  ;;  %s163_s6 = scalar_lea.hbm %s703_s0, %s361_s30 }
  0x13   : > { %s157_s7 = scalar_lea.vmem [#allocation2], %s360_s29  ;;  %s165_s9 = sshll.u32 %s163_s6, 4  ;;  %s166_s9 = int_to_ptr.hbm [resolvable:$true] %s165_s9 }
  0x14   : > { %s167_s8 = sshll.u32 %s157_s7, 4  ;;  %p375_p0 = pnand %p382_p13, %p614_p4  ;;  %s168_s8 = int_to_ptr.vmem [resolvable:$true] %s167_s8 }
  0x15   : > { %p362_p1 = scmp.ge.s32.totalorder %s550_s17, 1  ;;  %p172_p2 = scmp.lt.s32.totalorder %s550_s17, 3 }
  0x16   : > { %s154_s10 = scalar_lea.sflag [#allocation3], %s153_s28 }
  0x17   : > { %377 = dma.hbm_to_vmem [thread:$0]  (!%p375_p0), %s166_s9, 128, %s168_s8, %s154_s10  }
  0x18   : > { %p173_p3 = pnand %p362_p1, %p172_p2 }
  0x19   : > { %s647_s11 = sand.u32 (!%p173_p3), 1, %s534_s13  }
  0x1a   : > { %176 = sbr.rel (%p173_p3) target bundleno = 199 (0xc7), region = 32  ;;  %s363_s18 = sshll.u32 (!%p173_p3), %s647_s11, 3 }
  0x1b   : > { %s179_s19 = scalar_lea.sflag (!%p173_p3), [#allocation3], %s647_s11  ;;  %s182_s21 = scalar_lea.vmem (!%p173_p3), [#allocation2], %s363_s18 }
  0x1f   : > { %521 = dma.done.wait (%p620_p8), %s179_s19, 128  }
  0x20   : > { %523 = vsyncadd (%p620_p8), %s179_s19, 4294967168  ;;  %v552_v0 = vmov 0   ;;  %v206_v1 = vld [vmem:[%s182_s21] sm:$0xff]  ;;  %vm209_vm0 = vcmask 64512   ;;  %s367_s24 = sshll.u32 %s542_s15, 3  ;;  %s205_s6 = scalar_lea.vmem [#allocation5], %s363_s18 }
  0x21   : > { %433 = vset.pattern.permute.xlu0 %v552_v0  ;;  %v247_v2 = vld [vmem:[%s705_s2] sm:$0xff]  ;;  %v208_v3 = vmul.f32 %v206_v1, %v206_v1  ;;  %s269_s5 = scalar_lea.hbm %s706_s3, %s367_s24  ;;  %s271_s7 = sshll.u32 %s205_s6, 4  ;;  %s272_s7 = int_to_ptr.vmem [resolvable:$true] %s271_s7 }
  0x22   : > { %v207_v4 = vld [vmem:[%s704_s1] sm:$0xff]  ;;  %250 = vperm.xlu0 %433, %v247_v2   ;;  %s273_s8 = sshll.u32 %s269_s5, 4  ;;  %s257_s9 = scalar_lea.sflag [#allocation4], %s647_s11  ;;  %s274_s8 = int_to_ptr.hbm [resolvable:$true] %s273_s8 }
  0x23   : > { %228 = vmatpush.msra.mxu0 %v208_v3  ;;  %s482_s10 = sshra.s32 %s274_s8, 4  ;;  %s488_s22 = scalar_lea.hbm %s706_s3, 16  ;;  %s483_s10 = int_to_ptr.hbm [resolvable:$true] %s482_s10 }
  0x24   : > { %365 = vmatmul.msk.f32.vlgmr.msra.gmra.mxu0 %vm209_vm0, %v207_v4  ;;  %s484_s15 = scalar_lea.hbm %s483_s10, 8  ;;  %p489_p7 = scmp.lt.s32.totalorder %s483_s10, %s706_s3 }
  0x25   : > { %p485_p4 = scmp.ne.s32.totalorder %s483_s10, %s484_s15  ;;  %p490_p8 = scmp.lt.s32.totalorder %s488_s22, %s484_s15 }
  0x27   : > { %p486_p5 = pnand %p485_p4, %p624_p9  ;;  %p491_p10 = por %p490_p8, %p489_p7 }
  0x29   : > { %p487_p6 = pneg %p486_p5 }
  0x2b   : > { %p492_p13 = pnand %p491_p10, %p487_p6 }
  0x94   : > { %v251_v17 = vpop.permute.xlu0 %250 }
  0xa1   : > { %v230_v5 = vpop.f32.mrf.mxu0 }
  0xa2   : > { %434 = vrsqrt.f32 %v230_v5  ;;  %vm240_vm1 = vcmp.eq.f32.partialorder %v230_v5, inf  ;;  %v243_v13 = vand.u32 2147483648, %v230_v5  ;;  %vm242_vm2 = vcmp.eq.f32.partialorder %v230_v5, 0.0 }
  0xa8   : > { %v435_v6 = vpop.eup %434 }
  0xa9   : > { %v234_v7 = vmul.f32 %v435_v6, %v230_v5 }
  0xab   : > { %v235_v8 = vmul.f32 %v435_v6, %v234_v7 }
  0xad   : > { %v236_v9 = vmul.f32 0.5, %v235_v8 }
  0xaf   : > { %v237_v10 = vsub.f32 1.5, %v236_v9 }
  0xb1   : > { %v238_v11 = vmul.f32 %v435_v6, %v237_v10 }
  0xb3   : > { %v239_v12 = vmul.f32 %v238_v11, %v230_v5 }
  0xb5   : > { %v241_v14 = vsel %vm240_vm1, %v230_v5, %v239_v12 }
  0xb6   : > { %v244_v15 = vsel %vm242_vm2, %v243_v13, %v241_v14 }
  0xb7   : > { %v245_v16 = vadd.f32 1e-10, %v244_v15 }
  0xb9   : > { %436 = vrcp.f32 %v245_v16 }
  0xbf   : > { %v437_v18 = vpop.eup %436 }
  0xc0   : > { %v253_v19 = vmul.f32 %v437_v18, %v251_v17 }
  0xc2   : > { %v254_v20 = vmul.f32 %v253_v19, %v206_v1 }
  0xc4   : > { %255 = vst [vmem:[%s205_s6] sm:$0xff] %v254_v20 }
  0xc5   : > { %495 = shalt.err (!%p492_p13)
}
  0xc6   : > { %372 = dma.vmem_to_hbm [thread:$0]  (%p624_p9), %s272_s7, 128, %s274_s8, %s257_s9  }
  0xc7 PF: > { %s285_s11 = sand.u32 1, %s530_s12   ;;  %p379_p0 = pnand %p359_p12, %p631_p11 }
  0xc8   : > { %s286_s28 = scalar_lea.sflag [#allocation4], %s285_s11 }
  0xc9   : > { %p380_p1 = pneg %p379_p0 }
  0xcb   : > { %525 = dma.done.wait (%p380_p1), %s286_s28, 128  }
  0xcc   : > { %527 = vsyncadd (%p380_p1), %s286_s28, 4294967168  ;;  %s19_s17 = sadd.s32 1, %s550_s17   ;;  %s711_s12 = smov %s534_s13 }
  0xcd   : > { %p16_p2 = scmp.ge.s32.totalorder %s19_s17, 4   ;;  %s712_s13 = smov %s538_s14 }
  0xce   : > { %s713_s14 = smov %s629_s26  ;;  %s714_s15 = smov %s546_s16 }
  0xcf   : > { %s715_s16 = smov %s717_s20  ;;  %18 = sbr.rel (!%p16_p2) target bundleno = 6 (0x6), region = 77 }
  0xd4   :  { %292 = vsyncpa [#allocation3], 1 }
  0xd5   :  { %294 = vsyncpa [#allocation3 + $0x1], 1 }
  0xd6   :  { %295 = vsyncpa [#allocation4], 1 }
  0xd7   :  { %297 = vsyncpa [#allocation4 + $0x1], 1 }

</bundles_post_ra>
